<compile_context>
chip_gen: v6e
topology: v6e:2x2x1
jax: 0.10.0
libtpu: 0.0.40
codegen_flags: <defaults>
</compile_context>

<pallas_src>
import functools

import jax
import jax.numpy as jnp
from jax.experimental import pallas as pl
from jax.experimental.pallas import tpu as pltpu


# ----------------------------- helpers --------------------------------------

def _round_up(x: int, m: int) -> int:
    return (x + m - 1) // m * m


def _pick_tile(dim: int, cap: int, step: int) -> int:
    """Largest multiple of `step` that divides `dim` and is <= min(cap, dim).

    `dim` must already be a multiple of `step`, so `step` itself always divides.
    """
    cap = max(step, min(cap, dim))
    t = (cap // step) * step
    while t > step and dim % t != 0:
        t -= step
    return t


def _vmem_capacity_bytes() -> int:
    try:
        return int(pltpu.get_tpu_info().vmem_capacity_bytes)
    except Exception:
        return 64 << 20  # conservative fallback = v7x per-TC VMEM


# ----------------------------- kernels --------------------------------------

def _sigmoid_linear_kernel(x_ref, w_ref, b_ref, o_ref, acc_ref):
    """Multi-K-step kernel: f32 VMEM accumulator, bias + sigmoid epilogue."""
    k = pl.program_id(2)

    @pl.when(k == 0)
    def _init():
        acc_ref[...] = jnp.zeros_like(acc_ref)

    acc_ref[...] += jnp.dot(
        x_ref[...], w_ref[...], preferred_element_type=jnp.float32
    )

    @pl.when(k == pl.num_programs(2) - 1)
    def _epilogue():
        # exp/reciprocal ride the EUP slot, idle while MXU/store are the bottleneck.
        logits = acc_ref[...] + b_ref[...].astype(jnp.float32)
        o_ref[...] = jax.nn.sigmoid(logits).astype(o_ref.dtype)


def _sigmoid_linear_kernel_1k(x_ref, w_ref, b_ref, o_ref):
    """Single-K-step fast path: no accumulator scratch round trip."""
    acc = jnp.dot(x_ref[...], w_ref[...], preferred_element_type=jnp.float32)
    o_ref[...] = jax.nn.sigmoid(acc + b_ref[...].astype(jnp.float32)).astype(o_ref.dtype)


# ----------------------------- wrappers --------------------------------------

def prepare_sigmoid_linear(w, b, *, compute_dtype=jnp.float32):
    """One-time parameter setup: cast + pad W/b to hardware minimums (128).

    Call this once when parameters are created/loaded so the (large) weight matrix
    is never re-padded or re-cast on the per-forward path.
    """
    in_features, out_features = w.shape
    K = _round_up(in_features, 128)
    N = _round_up(out_features, 128)

    w_p = w.astype(compute_dtype)
    if (K, N) != (in_features, out_features):
        w_p = jnp.pad(w_p, ((0, K - in_features), (0, N - out_features)))

    b_p = b.astype(jnp.float32)
    if N != out_features:
        b_p = jnp.pad(b_p, ((0, N - out_features),))
    b_p = b_p.reshape(1, N)
    return w_p, b_p


def sigmoid_linear(x, w_p, b_p, *, out_features, compute_dtype=jnp.float32,
                   tm=None, tn=None, tk=None):
    """sigmoid(x @ W + b) with pre-padded params from prepare_sigmoid_linear."""
    batch, in_features = x.shape
    K, N = w_p.shape
    assert K >= in_features and K % 128 == 0 and N % 128 == 0
    out_dtype = x.dtype

    M = _round_up(batch, 8)

    comp_bytes = jnp.dtype(compute_dtype).itemsize
    out_bytes = jnp.dtype(out_dtype).itemsize
    vmem_budget = int(0.7 * _vmem_capacity_bytes())

    # ---- tile plan: divisors of the 8/128-rounded dims, sized to the VMEM budget ----
    if tm is None:
        tm = _pick_tile(M, cap=256, step=8)
    if tn is None:
        tn = _pick_tile(N, cap=512, step=128)
        # v7x has 2 TensorCores: keep >= 2 blocks on a parallel axis when the
        # M grid collapses to a single block.
        if M // tm == 1 and N // tn == 1 and N >= 256:
            tn = _pick_tile(N, cap=N // 2, step=128)
    if tk is None:
        tk = _pick_tile(K, cap=2048, step=128)

    def plan_bytes(tm_, tn_, tk_, w_bufs=2):
        x_b = 2 * tm_ * tk_ * comp_bytes
        w_b = w_bufs * tk_ * tn_ * comp_bytes
        b_b = 2 * tn_ * 4
        o_b = 2 * tm_ * tn_ * out_bytes
        acc_b = tm_ * tn_ * 4 if K // tk_ > 1 else 0
        return x_b + w_b + b_b + o_b + acc_b

    # shrink the K tile (then the N tile) until the double-buffered plan fits
    while plan_bytes(tm, tn, tk) > vmem_budget and tk > 128:
        tk = _pick_tile(K, cap=tk - 128, step=128)
    while plan_bytes(tm, tn, tk) > vmem_budget and tn > 128:
        tn = _pick_tile(N, cap=tn - 128, step=128)

    k_steps = K // tk
    grid_m, grid_n = M // tm, N // tn

    # W is the dominant DMA stream: triple-buffer it when there are enough K steps
    # to hide behind and the extra tk x tn tile still fits the budget.
    w_bufs = 3 if (k_steps >= 3 and plan_bytes(tm, tn, tk, 3) <= vmem_budget) else 2

    vmem_limit = int(min(plan_bytes(tm, tn, tk, w_bufs) + (2 << 20), vmem_budget))
    vmem_limit = max(vmem_limit, 4 << 20)

    # ---- per-call input prep: only x (small, batch-dependent) is padded/cast ----
    x_c = x.astype(compute_dtype)
    if (M, K) != (batch, in_features):
        x_c = jnp.pad(x_c, ((0, M - batch), (0, K - in_features)))

    cost = pl.CostEstimate(
        flops=2 * batch * in_features * out_features,
        transcendentals=2 * batch * out_features,  # sigmoid ~ exp + reciprocal
        bytes_accessed=int(
            out_bytes * batch * in_features
            + comp_bytes * K * N
            + out_bytes * batch * out_features
        ),
    )

    if k_steps == 1:
        out_padded = pl.pallas_call(
            _sigmoid_linear_kernel_1k,
            out_shape=jax.ShapeDtypeStruct((M, N), out_dtype),
            grid_spec=pltpu.PrefetchScalarGridSpec(
                num_scalar_prefetch=0,
                grid=(grid_m, grid_n),
                in_specs=[
                    pl.BlockSpec((tm, tk), lambda i, j: (i, 0)),
                    pl.BlockSpec((tk, tn), lambda i, j: (0, j)),
                    pl.BlockSpec((1, tn), lambda i, j: (0, j)),
                ],
                out_specs=pl.BlockSpec((tm, tn), lambda i, j: (i, j)),
            ),
            compiler_params=pltpu.CompilerParams(
                dimension_semantics=("parallel", "parallel"),
                vmem_limit_bytes=vmem_limit,
            ),
            cost_estimate=cost,
        )(x_c, w_p, b_p)
    else:
        if w_bufs == 3:
            w_spec = pl.BlockSpec((tk, tn), lambda i, j, k: (k, j),
                                  pipeline_mode=pl.Buffered(3))
        else:
            w_spec = pl.BlockSpec((tk, tn), lambda i, j, k: (k, j))
        out_padded = pl.pallas_call(
            _sigmoid_linear_kernel,
            out_shape=jax.ShapeDtypeStruct((M, N), out_dtype),
            grid_spec=pltpu.PrefetchScalarGridSpec(
                num_scalar_prefetch=0,
                grid=(grid_m, grid_n, k_steps),
                in_specs=[
                    pl.BlockSpec((tm, tk), lambda i, j, k: (i, k)),
                    w_spec,
                    # bias block ignores K: resident across the reduction, never re-DMA'd
                    pl.BlockSpec((1, tn), lambda i, j, k: (0, j)),
                ],
                out_specs=pl.BlockSpec((tm, tn), lambda i, j, k: (i, j)),
                scratch_shapes=[pltpu.VMEM((tm, tn), jnp.float32)],
            ),
            compiler_params=pltpu.CompilerParams(
                dimension_semantics=("parallel", "parallel", "arbitrary"),
                vmem_limit_bytes=vmem_limit,
            ),
            cost_estimate=cost,
        )(x_c, w_p, b_p)

    return out_padded[:batch, :out_features]


def model_with_sigmoid(x, w, b, **kwargs):
    """One-shot convenience (re-pads W per call). In a hot loop, prefer
    prepare_sigmoid_linear() once + sigmoid_linear() per forward."""
    w_p, b_p = prepare_sigmoid_linear(
        w, b, compute_dtype=kwargs.get("compute_dtype", jnp.float32))
    return sigmoid_linear(x, w_p, b_p, out_features=w.shape[1], **kwargs)


if __name__ == "__main__":
    key = jax.random.PRNGKey(0)

    # --- Test 1: module-implied small shapes; exercises the single-K fast path. ---
    batch, in_features, out_features = 8, 32, 16
    k1, k2, k3, k4 = jax.random.split(key, 4)
    x = jax.random.normal(k1, (batch, in_features), dtype=jnp.float32)
    w = jax.random.normal(k2, (in_features, out_features), dtype=jnp.float32) * 0.1
    b = jax.random.normal(k3, (out_features,), dtype=jnp.float32) * 0.1

    w_p, b_p = prepare_sigmoid_linear(w, b)  # one-time parameter setup
    fwd = jax.jit(functools.partial(sigmoid_linear, out_features=out_features))
    out = jax.block_until_ready(fwd(x, w_p, b_p))

    ref = jax.nn.sigmoid(jnp.dot(x, w, precision=jax.lax.Precision.HIGHEST) + b)
    assert out.shape == (batch, out_features)
    assert jnp.allclose(out, ref, atol=1e-4, rtol=1e-4)
    assert bool(jnp.all((out >= 0.0) & (out <= 1.0)))

    # --- Test 2: forced small K tile -> multi-K accumulator kernel, the
    #     >=2-N-block (v7x) rule and the triple-buffered W stream. ---
    batch2, in2, outf2 = 16, 512, 256
    k5, k6, k7 = jax.random.split(k4, 3)
    x2 = jax.random.normal(k5, (batch2, in2), dtype=jnp.float32)
    w2 = jax.random.normal(k6, (in2, outf2), dtype=jnp.float32) * 0.05
    b2 = jax.random.normal(k7, (outf2,), dtype=jnp.float32) * 0.1

    w2_p, b2_p = prepare_sigmoid_linear(w2, b2)
    fwd2 = jax.jit(functools.partial(sigmoid_linear, out_features=outf2, tk=128))
    out2 = jax.block_until_ready(fwd2(x2, w2_p, b2_p))

    ref2 = jax.nn.sigmoid(jnp.dot(x2, w2, precision=jax.lax.Precision.HIGHEST) + b2)
    assert out2.shape == (batch2, outf2)
    assert jnp.allclose(out2, ref2, atol=1e-4, rtol=1e-4)
    assert bool(jnp.all((out2 >= 0.0) & (out2 <= 1.0)))

    print("KERNEL_OK")
</pallas_src>

<mosaic_0001>
module attributes {stable_mosaic.version = 11 : i64} {
  func.func @_sigmoid_linear_kernel_1k(%arg0: i32, %arg1: i32, %arg2: memref<8x128xf32, #tpu.memory_space<vmem>>, %arg3: memref<128x128xf32, #tpu.memory_space<vmem>>, %arg4: memref<1x128xf32, #tpu.memory_space<vmem>>, %arg5: memref<8x128xf32, #tpu.memory_space<vmem>>) attributes {dimension_semantics = [#tpu.dimension_semantics<parallel>, #tpu.dimension_semantics<parallel>], iteration_bounds = array<i64: 1, 1>, scalar_prefetch = 0 : i64, scratch_operands = 0 : i64, tpu.core_type = #tpu.core_type<tc>, window_params = [{transform_indices = @transform_0, window_bounds = array<i64: 8, 128>}, {transform_indices = @transform_1, window_bounds = array<i64: 128, 128>}, {transform_indices = @transform_2, window_bounds = array<i64: 1, 128>}, {transform_indices = @transform_3, window_bounds = array<i64: 8, 128>}]} {
    %c0 = arith.constant 0 : index
    %c0_0 = arith.constant 0 : index
    %0 = vector.load %arg2[%c0, %c0_0] : memref<8x128xf32, #tpu.memory_space<vmem>>, vector<8x128xf32>
    %c0_1 = arith.constant 0 : index
    %c0_2 = arith.constant 0 : index
    %1 = vector.load %arg3[%c0_1, %c0_2] : memref<128x128xf32, #tpu.memory_space<vmem>>, vector<128x128xf32>
    %cst = arith.constant dense<0.000000e+00> : vector<8x128xf32>
    %2 = tpu.matmul %0, %1, %cst {dimension_numbers = #tpu.dot_dimension_numbers<[1], [0], [0], [1], [0, 0, 1, 1], [], []>} : vector<8x128xf32>, vector<128x128xf32>, vector<8x128xf32> -> vector<8x128xf32>
    %c0_3 = arith.constant 0 : index
    %c0_4 = arith.constant 0 : index
    %3 = vector.load %arg4[%c0_3, %c0_4] : memref<1x128xf32, #tpu.memory_space<vmem>>, vector<1x128xf32>
    %4 = vector.broadcast %3 : vector<1x128xf32> to vector<8x128xf32>
    %5 = arith.addf %2, %4 : vector<8x128xf32>
    %6 = arith.negf %5 : vector<8x128xf32>
    %7 = math.exp %6 : vector<8x128xf32>
    %cst_5 = arith.constant 1.000000e+00 : f32
    %8 = vector.broadcast %cst_5 : f32 to vector<8x128xf32>
    %9 = arith.addf %8, %7 : vector<8x128xf32>
    %10 = arith.divf %8, %9 : vector<8x128xf32>
    %c0_6 = arith.constant 0 : index
    %c0_7 = arith.constant 0 : index
    %11 = vector.load %arg5[%c0_6, %c0_7] : memref<8x128xf32, #tpu.memory_space<vmem>>, vector<8x128xf32>
    tpu.vector_store %arg5[%c0_6, %c0_7], %10 {strides = array<i32>} : memref<8x128xf32, #tpu.memory_space<vmem>>, vector<8x128xf32>,
    return
  }
  func.func @transform_0(%arg0: i32, %arg1: i32) -> (i32, i32) {
    %c0_i32 = arith.constant 0 : i32
    %c0_i32_0 = arith.constant 0 : i32
    return %arg0, %c0_i32 : i32, i32
  }
  func.func @transform_1(%arg0: i32, %arg1: i32) -> (i32, i32) {
    %c0_i32 = arith.constant 0 : i32
    %c0_i32_0 = arith.constant 0 : i32
    return %c0_i32, %arg1 : i32, i32
  }
  func.func @transform_2(%arg0: i32, %arg1: i32) -> (i32, i32) {
    %c0_i32 = arith.constant 0 : i32
    %c0_i32_0 = arith.constant 0 : i32
    return %c0_i32, %arg1 : i32, i32
  }
  func.func @transform_3(%arg0: i32, %arg1: i32) -> (i32, i32) {
    %c0_i32 = arith.constant 0 : i32
    return %arg0, %arg1 : i32, i32
  }
}

</mosaic_0001>

<bundles_post_ra>
// kernel: sigmoid_linear.1
= control target key start
LH: loop header
LB: loop body
LE: loop exit
PB: predicated region body
PF: predicated region fallthrough
CT: control target
= control target key end

     0   :  { %8 = vsyncpa [#allocation3], 0  ;;  %s291_s0 = inlined_call_operand.vmem [shape: f32[8,128], index: 0, kind: input, shape index: {}]   ;;  %s292_s1 = inlined_call_operand.hbm [shape: f32[128,128], index: 1, kind: input, shape index: {}]   ;;  %s293_s2 = inlined_call_operand.vmem [shape: f32[1,128], index: 2, kind: input, shape index: {}]   ;;  %s294_s3 = inlined_call_operand.hbm [shape: f32[8,128], index: 3, kind: output, shape index: {}]  }
   0x1   :  { %9 = vsyncpa [#allocation4], 0  ;;  %s253_s12 = smov [#allocation2]  }
   0x2   :  { %s17_s13 = sshll.u32 %s253_s12, 4  ;;  %s18_s13 = int_to_ptr.vmem [resolvable:$true] %s17_s13 }
   0x3   :  { %s217_s14 = scalar_lea.vmem %s18_s13, 2048  ;;  %p222_p1 = scmp.lt.s32.totalorder %s18_s13, %s18_s13 }
   0x4   :  { %p218_p0 = scmp.ne.s32.totalorder %s18_s13, %s217_s14  ;;  %p223_p2 = scmp.lt.s32.totalorder %s217_s14, %s217_s14 }
   0x6   :  { %p224_p3 = por %p223_p2, %p222_p1 }
   0x8   :  { %p225_p4 = pnand %p224_p3, %p218_p0 }
   0xa   :  { %228 = shalt.err (!%p225_p4)
}
   0xb   :  { %s254_s15 = smov 128   ;;  %s255_s16 = smov 8  }
   0xc   :  { %23 = dma.hbm_to_vmem [thread:$0]  %s292_s1, 2048, %s18_s13, [#allocation3], %s254_s15, %s254_s15, %s255_s16  }
   0xd   :  { %249 = dma.done.wait [#allocation3], 2048  }
   0xe   :  { %250 = vsyncadd [#allocation3], 4294965248  ;;  %v256_v0 = vmov 0.0   ;;  %vm257_vm0 = vmmov 0   ;;  %v45_v1 = vld [vmem:[#allocation2 + $0x78] sm:$0xff]  ;;  %v44_v2 = vld [vmem:[#allocation2 + $0x70] sm:$0xff] }
   0xf   :  { %164 = vmatprep.subr.mxu0 %v256_v0  ;;  %196 = vmatprep.mubr.msk.f32.mxu0 %vm257_vm0, %v256_v0  ;;  %v43_v3 = vld [vmem:[#allocation2 + $0x68] sm:$0xff]  ;;  %v42_v4 = vld [vmem:[#allocation2 + $0x60] sm:$0xff]  ;;  %v41_v5 = vld [vmem:[#allocation2 + $0x58] sm:$0xff]  ;;  %s258_s22 = smov [#allocation5]  }
  0x10   :  { %165 = vmatpush3.msra.mxu0 %v45_v1  ;;  %v40_v6 = vld [vmem:[#allocation2 + $0x50] sm:$0xff]  ;;  %v39_v7 = vld [vmem:[#allocation2 + $0x48] sm:$0xff]  ;;  %v38_v8 = vld [vmem:[#allocation2 + $0x40] sm:$0xff]  ;;  %s136_s23 = sshll.u32 %s258_s22, 4  ;;  %s137_s23 = int_to_ptr.vmem [resolvable:$true] %s136_s23 }
  0x11   :  { %166 = vmatprep.subr.mxu0 %v256_v0  ;;  %v37_v9 = vld [vmem:[#allocation2 + $0x38] sm:$0xff]  ;;  %v36_v10 = vld [vmem:[#allocation2 + $0x30] sm:$0xff]  ;;  %v35_v11 = vld [vmem:[#allocation2 + $0x28] sm:$0xff]  ;;  %p234_p6 = scmp.lt.s32.totalorder %s137_s23, %s137_s23 }
  0x12   :  { %167 = vmatpush3.msra.mxu0 %v44_v2  ;;  %v34_v12 = vld [vmem:[#allocation2 + $0x20] sm:$0xff]  ;;  %v33_v13 = vld [vmem:[#allocation2 + $0x18] sm:$0xff]  ;;  %v32_v14 = vld [vmem:[#allocation2 + $0x10] sm:$0xff] }
  0x13   :  { %168 = vmatprep.subr.mxu0 %v256_v0  ;;  %v31_v15 = vld [vmem:[#allocation2 + $0x8] sm:$0xff]  ;;  %v30_v16 = vld [vmem:[#allocation2] sm:$0xff] }
  0x14   :  { %169 = vmatpush3.msra.mxu0 %v43_v3  ;;  %v29_v17 = vld [vmem:[%s291_s0] sm:$0xff]  ;;  %s229_s0 = scalar_lea.vmem %s137_s23, 128 }
  0x15   :  { %170 = vmatprep.subr.mxu0 %v256_v0  ;;  %v145_v18 = vld [vmem:[%s293_s2] ss:$0 sm:$0xff]  ;;  %p230_p5 = scmp.ne.s32.totalorder %s137_s23, %s229_s0  ;;  %p235_p7 = scmp.lt.s32.totalorder %s229_s0, %s229_s0 }
  0x16   :  { %171 = vmatpush3.msra.mxu0 %v42_v4 }
  0x17   :  { %172 = vmatprep.subr.mxu0 %v256_v0  ;;  %p236_p8 = por %p235_p7, %p234_p6 }
  0x18   :  { %173 = vmatpush3.msra.mxu0 %v41_v5 }
  0x19   :  { %174 = vmatprep.subr.mxu0 %v256_v0  ;;  %p237_p9 = pnand %p236_p8, %p230_p5 }
  0x1a   :  { %175 = vmatpush3.msra.mxu0 %v40_v6 }
  0x1b   :  { %176 = vmatprep.subr.mxu0 %v256_v0 }
  0x1c   :  { %177 = vmatpush3.msra.mxu0 %v39_v7 }
  0x1d   :  { %178 = vmatprep.subr.mxu0 %v256_v0 }
  0x1e   :  { %179 = vmatpush3.msra.mxu0 %v38_v8 }
  0x1f   :  { %180 = vmatprep.subr.mxu0 %v256_v0 }
  0x20   :  { %181 = vmatpush3.msra.mxu0 %v37_v9 }
  0x21   :  { %182 = vmatprep.subr.mxu0 %v256_v0 }
  0x22   :  { %183 = vmatpush3.msra.mxu0 %v36_v10 }
  0x23   :  { %184 = vmatprep.subr.mxu0 %v256_v0 }
  0x24   :  { %185 = vmatpush3.msra.mxu0 %v35_v11 }
  0x25   :  { %186 = vmatprep.subr.mxu0 %v256_v0 }
  0x26   :  { %187 = vmatpush3.msra.mxu0 %v34_v12 }
  0x27   :  { %188 = vmatprep.subr.mxu0 %v256_v0 }
  0x28   :  { %189 = vmatpush3.msra.mxu0 %v33_v13 }
  0x29   :  { %190 = vmatprep.subr.mxu0 %v256_v0 }
  0x2a   :  { %191 = vmatpush3.msra.mxu0 %v32_v14 }
  0x2b   :  { %192 = vmatprep.subr.mxu0 %v256_v0 }
  0x2c   :  { %193 = vmatpush3.msra.mxu0 %v31_v15 }
  0x2d   :  { %194 = vmatprep.subr.mxu0 %v256_v0 }
  0x2e   :  { %195 = vmatpush3.msra.mxu0 %v30_v16 }
  0x2f   :  { %197 = vmatmul.mubr.f32.vlgmr.msra.gmra.mxu0 %v29_v17 }
  0xef   :  { %v119_v19 = vpop.f32.mrf.mxu0 }
  0xf0   :  { %v120_v20 = vadd.f32 %v145_v18, %v119_v19 }
  0xf1   :  { %v198_v21 = vpop.f32.mrf.mxu0 }
  0xf2   :  { %v146_v22 = vmul.f32 -1.442695, %v120_v20 }
  0xf4   :  { %205 = vpow2.f32 %v146_v22 }
 0x101   :  { %v206_v23 = vpop.eup %205 }
 0x102   :  { %v126_v24 = vadd.f32 1.0, %v206_v23 }
 0x104   :  { %207 = vrcp.f32 %v126_v24 }
 0x111   :  { %v208_v25 = vpop.eup %207 }
 0x112   :  { %129 = vst [vmem:[#allocation5] sm:$0xff] %v208_v25 }
 0x113   :  { %240 = shalt.err (!%p237_p9)
}
 0x114   :  { %139 = dma.vmem_to_hbm [thread:$0]  %s137_s23, 128, %s294_s3, [#allocation4]  }
 0x115   :  { %251 = dma.done.wait [#allocation4], 128  }
 0x116   :  { %252 = vsyncadd [#allocation4], 4294967168 }
 0x117   :  { %143 = vsyncpa [#allocation3], 1 }
 0x118   :  { %144 = vsyncpa [#allocation4], 1 }

</bundles_post_ra>
